<compile_context>
chip_gen: v5e
topology: v5e:2x2
jax: 0.10.0
libtpu: 0.0.40
codegen_flags: <defaults>
</compile_context>

<pallas_src>
import functools

import jax
import jax.numpy as jnp
from jax.experimental import pallas as pl
from jax.experimental.pallas import tpu as pltpu


def _pick_tile(hw, n_batch, in_row_bytes, out_row_bytes, budget_bytes,
               max_tile_cap):
    """Largest balanced lane tile that fits the VMEM budget.

    in_row_bytes / out_row_bytes: VMEM bytes per spatial position for the
    (double-buffered) input and output blocks (output is lane-padded to 128).
    """
    per_lane = 2 * (in_row_bytes + out_row_bytes)          # x2: double buffer
    vmem_tile = max(128, (budget_bytes // per_lane) // 128 * 128)
    max_tile = min(vmem_tile, max_tile_cap)
    # v7x megacore: if N==1 a single-step grid leaves one TensorCore idle.
    min_steps = 2 if (n_batch == 1 and hw >= 256) else 1
    steps = max(min_steps, -(-hw // max_tile))             # ceil
    tile = -(-hw // steps)                                  # balanced tiles
    if tile > 128:
        tile = -(-tile // 128) * 128                        # align to 128 lanes
    return min(tile, hw)


def _pick_chunk(tile):
    """In-kernel relayout chunk (bounds vreg pressure of the transpose)."""
    for c in (512, 256, 128):
        if tile % c == 0:
            return c
    return tile                                             # small / odd tiles


def _make_bbox_head_kernel(co, tile, chunk):
    n_chunks = tile // chunk

    def kernel(x_ref, w_ref, b_ref, o_ref):
        # x_ref: (C, tile)  w_ref: (Co_pad, C)  b_ref: (Co_pad, 1)
        # o_ref: (tile, co)   (channel-minor, i.e. already NHWC-flattened)
        w = w_ref[...]
        b = b_ref[...]

        def emit(off):
            xc = x_ref[:, pl.ds(off, chunk)]                        # (C, chunk)
            acc = jnp.dot(w, xc, preferred_element_type=jnp.float32) + b
            # (Co_pad, chunk) -> (chunk, Co_pad) -> keep real co columns.
            out = jnp.transpose(acc, (1, 0))[:, :co].astype(o_ref.dtype)
            o_ref[pl.ds(off, chunk), :] = out

        if n_chunks <= 8:
            for i in range(n_chunks):                 # unrolled, static offsets
                emit(i * chunk)
        else:
            def body(i, carry):
                emit(pl.multiple_of(i * chunk, chunk))
                return carry
            jax.lax.fori_loop(0, n_chunks, body, 0)

    return kernel


def bbox_head_forward(x_nchw, weight, bias, num_anchors=3, *,
                      compute_dtype=None,
                      vmem_block_budget=20 * 1024 * 1024,
                      max_tile=32768):
    """Forward pass of BboxHead.

    x_nchw: (N, C, H, W); weight: (A*4, C, 1, 1); bias: (A*4,).
    Returns (N, H*W*A, 4) in the dtype of x_nchw.
    """
    n, c, h, w = x_nchw.shape
    co = weight.shape[0]
    assert co == num_anchors * 4
    hw = h * w
    out_dtype = x_nchw.dtype

    # Channel-major, zero-copy: NCHW -> (N, C, H*W).
    x_cm = x_nchw.reshape(n, c, hw)
    if compute_dtype is not None:
        # NOTE: a standalone cast is an extra HBM pass (read 4B + write 2B per
        # element); prefer producing x already in the desired dtype upstream.
        x_cm = x_cm.astype(compute_dtype)
    kdt = x_cm.dtype

    # Pad Co up to a sublane multiple so the in-kernel transpose is aligned.
    co_pad = -(-co // 8) * 8
    w_mat = jnp.zeros((co_pad, c), dtype=kdt).at[:co].set(
        weight[:, :, 0, 0].astype(kdt))
    b_mat = jnp.zeros((co_pad, 1), dtype=jnp.float32).at[:co, 0].set(
        bias.astype(jnp.float32))

    in_row_bytes = (-(-c // 8) * 8) * jnp.dtype(kdt).itemsize
    out_row_bytes = 128 * jnp.dtype(out_dtype).itemsize     # lane-padded VMEM
    tile = _pick_tile(hw, n, in_row_bytes, out_row_bytes,
                      vmem_block_budget, max_tile)
    chunk = _pick_chunk(tile)
    grid = (n, pl.cdiv(hw, tile))

    kernel = _make_bbox_head_kernel(co, tile, chunk)

    cost = pl.CostEstimate(
        flops=2 * n * hw * c * co,
        transcendentals=0,
        bytes_accessed=(x_cm.size * x_cm.dtype.itemsize
                        + w_mat.size * w_mat.dtype.itemsize
                        + b_mat.size * b_mat.dtype.itemsize
                        + n * hw * co * jnp.dtype(out_dtype).itemsize),
    )

    # Partial last tile (hw % tile != 0): out-of-bounds activation LANES are
    # read as garbage, but the dot only contracts over C, so garbage only
    # lands in output ROWS that are masked/dropped on writeback — correct by
    # construction; do not "fix".
    out = pl.pallas_call(
        kernel,
        out_shape=jax.ShapeDtypeStruct((n, hw, co), out_dtype),
        grid_spec=pltpu.PrefetchScalarGridSpec(
            num_scalar_prefetch=0,
            grid=grid,
            in_specs=[
                # activation tile: lane dim is the spatial tile (lane-dense)
                pl.BlockSpec((None, c, tile), lambda ni, ti: (ni, 0, ti)),
                # full (Co_pad, C) weight, resident across the grid
                pl.BlockSpec((co_pad, c), lambda ni, ti: (0, 0)),
                # bias as a (Co_pad, 1) column, broadcast pre-transpose
                pl.BlockSpec((co_pad, 1), lambda ni, ti: (0, 0)),
            ],
            # channel-minor output block: spans the full (co)-wide minor dim,
            # so the HBM writeback stays fully contiguous.
            out_specs=pl.BlockSpec((None, tile, co), lambda ni, ti: (ni, ti, 0)),
        ),
        compiler_params=pltpu.CompilerParams(
            dimension_semantics=("parallel", "parallel"),
            vmem_limit_bytes=48 * 1024 * 1024),
        cost_estimate=cost,
    )(x_cm, w_mat, b_mat)

    # (N, HW, Co) row-major is bit-identical to (N, HW*A, 4): free reshape,
    # matching torch's permute(0,2,3,1).contiguous().view(N, -1, 4).
    return out.reshape(n, hw * num_anchors, 4)


def _reference(x, weight, bias, num_anchors):
    n, _, h, w = x.shape
    ref = jnp.einsum("nchw,oc->nhwo", x, weight[:, :, 0, 0]) + bias
    return ref.reshape(n, h * w * num_anchors, 4)


if __name__ == "__main__":
    key = jax.random.PRNGKey(0)
    k_x, k_w, k_b, k_x2, k_x3, k_x4 = jax.random.split(key, 6)
    A = 3

    # Test 1: small shapes consistent with the module: N=2, C=16, H=W=8.
    N, C, H, W = 2, 16, 8, 8
    x = jax.random.normal(k_x, (N, C, H, W), dtype=jnp.float32)
    weight = jax.random.normal(k_w, (A * 4, C, 1, 1), dtype=jnp.float32) * 0.05
    bias = jax.random.normal(k_b, (A * 4,), dtype=jnp.float32) * 0.05
    ref = _reference(x, weight, bias, A)

    out = bbox_head_forward(x, weight, bias, num_anchors=A)
    out = jax.block_until_ready(out)
    assert out.shape == (N, H * W * A, 4), out.shape
    assert jnp.allclose(out, ref, atol=1e-3, rtol=1e-3)

    # Optional bf16-fed (f32-accumulated) path still works, looser tolerance.
    out_bf16 = bbox_head_forward(x, weight, bias, num_anchors=A,
                                 compute_dtype=jnp.bfloat16)
    out_bf16 = jax.block_until_ready(out_bf16)
    assert jnp.allclose(out_bf16, ref, atol=3e-2, rtol=3e-2)

    # Test 2: N=1 -> hw axis split into >=2 grid steps (megacore path).
    N2, C2, H2, W2 = 1, 32, 16, 16
    x2 = jax.random.normal(k_x2, (N2, C2, H2, W2), dtype=jnp.float32)
    w2 = jax.random.normal(k_w, (A * 4, C2, 1, 1), dtype=jnp.float32) * 0.05
    b2 = jax.random.normal(k_b, (A * 4,), dtype=jnp.float32) * 0.05
    out2 = jax.block_until_ready(
        bbox_head_forward(x2, w2, b2, num_anchors=A))
    assert out2.shape == (N2, H2 * W2 * A, 4), out2.shape
    assert jnp.allclose(out2, _reference(x2, w2, b2, A), atol=1e-3, rtol=1e-3)

    # Test 3: ragged hw (H=W=40 -> hw=1600): partial last block + chunk loop.
    N3, C3, H3, W3 = 1, 16, 40, 40
    x3 = jax.random.normal(k_x3, (N3, C3, H3, W3), dtype=jnp.float32)
    out3 = jax.block_until_ready(
        bbox_head_forward(x3, weight, bias, num_anchors=A))
    assert out3.shape == (N3, H3 * W3 * A, 4), out3.shape
    assert jnp.allclose(out3, _reference(x3, weight, bias, A),
                        atol=1e-3, rtol=1e-3)

    # Test 4: H=W=48 -> hw=2304: many chunks per tile (fori_loop path).
    N4, C4, H4, W4 = 1, 16, 48, 48
    x4 = jax.random.normal(k_x4, (N4, C4, H4, W4), dtype=jnp.float32)
    out4 = jax.block_until_ready(
        bbox_head_forward(x4, weight, bias, num_anchors=A))
    assert out4.shape == (N4, H4 * W4 * A, 4), out4.shape
    assert jnp.allclose(out4, _reference(x4, weight, bias, A),
                        atol=1e-3, rtol=1e-3)

    print("KERNEL_OK")
</pallas_src>

<mosaic_0001>
module attributes {stable_mosaic.version = 11 : i64} {
  func.func @kernel(%arg0: i32, %arg1: i32, %arg2: memref<1x16x64xf32, #tpu.memory_space<vmem>>, %arg3: memref<16x16xf32, #tpu.memory_space<vmem>>, %arg4: memref<16x1xf32, #tpu.memory_space<vmem>>, %arg5: memref<1x64x12xf32, #tpu.memory_space<vmem>>) attributes {dimension_semantics = [#tpu.dimension_semantics<parallel>, #tpu.dimension_semantics<parallel>], iteration_bounds = array<i64: 2, 1>, scalar_prefetch = 0 : i64, scratch_operands = 0 : i64, tpu.core_type = #tpu.core_type<tc>, window_params = [{transform_indices = @transform_0, window_bounds = array<i64: 1, 16, 64>}, {pipeline_mode = #tpu.pipeline_mode<synchronous>, transform_indices = @transform_1, window_bounds = array<i64: 16, 16>}, {pipeline_mode = #tpu.pipeline_mode<synchronous>, transform_indices = @transform_2, window_bounds = array<i64: 16, 1>}, {transform_indices = @transform_3, window_bounds = array<i64: 1, 64, 12>}]} {
    %c0 = arith.constant 0 : index
    %c0_0 = arith.constant 0 : index
    %0 = vector.load %arg3[%c0, %c0_0] : memref<16x16xf32, #tpu.memory_space<vmem>>, vector<16x16xf32>
    %c0_1 = arith.constant 0 : index
    %c0_2 = arith.constant 0 : index
    %1 = vector.load %arg4[%c0_1, %c0_2] : memref<16x1xf32, #tpu.memory_space<vmem>>, vector<16x1xf32>
    %c0_3 = arith.constant 0 : index
    %c0_4 = arith.constant 0 : index
    %c0_5 = arith.constant 0 : index
    %2 = vector.load %arg2[%c0_3, %c0_4, %c0_5] : memref<1x16x64xf32, #tpu.memory_space<vmem>>, vector<1x16x64xf32>
    %3 = vector.shape_cast %2 : vector<1x16x64xf32> to vector<16x64xf32>
    %cst = arith.constant dense<0.000000e+00> : vector<16x64xf32>
    %4 = tpu.matmul %0, %3, %cst {dimension_numbers = #tpu.dot_dimension_numbers<[1], [0], [0], [1], [0, 0, 1, 1], [], []>} : vector<16x16xf32>, vector<16x64xf32>, vector<16x64xf32> -> vector<16x64xf32>
    %5 = vector.broadcast %1 : vector<16x1xf32> to vector<16x64xf32>
    %6 = arith.addf %4, %5 : vector<16x64xf32>
    %7 = tpu.transpose %6, [1, 0] : vector<16x64xf32> -> vector<64x16xf32>
    %8 = vector.extract_strided_slice %7 {offsets = [0, 0], sizes = [64, 12], strides = [1, 1]} : vector<64x16xf32> to vector<64x12xf32>
    %c0_6 = arith.constant 0 : index
    %c0_7 = arith.constant 0 : index
    %c0_8 = arith.constant 0 : index
    %9 = vector.load %arg5[%c0_6, %c0_7, %c0_8] : memref<1x64x12xf32, #tpu.memory_space<vmem>>, vector<1x64x12xf32>
    %10 = vector.shape_cast %9 : vector<1x64x12xf32> to vector<64x12xf32>
    %11 = vector.shape_cast %8 : vector<64x12xf32> to vector<1x64x12xf32>
    tpu.vector_store %arg5[%c0_6, %c0_7, %c0_8], %11 {strides = array<i32>} : memref<1x64x12xf32, #tpu.memory_space<vmem>>, vector<1x64x12xf32>,
    return
  }
  func.func @transform_0(%arg0: i32, %arg1: i32) -> (i32, i32, i32) {
    %c0_i32 = arith.constant 0 : i32
    %c0_i32_0 = arith.constant 0 : i32
    return %arg0, %c0_i32, %arg1 : i32, i32, i32
  }
  func.func @transform_1(%arg0: i32, %arg1: i32) -> (i32, i32) {
    %c0_i32 = arith.constant 0 : i32
    %c0_i32_0 = arith.constant 0 : i32
    %c0_i32_1 = arith.constant 0 : i32
    return %c0_i32, %c0_i32_0 : i32, i32
  }
  func.func @transform_2(%arg0: i32, %arg1: i32) -> (i32, i32) {
    %c0_i32 = arith.constant 0 : i32
    %c0_i32_0 = arith.constant 0 : i32
    %c0_i32_1 = arith.constant 0 : i32
    return %c0_i32, %c0_i32_0 : i32, i32
  }
  func.func @transform_3(%arg0: i32, %arg1: i32) -> (i32, i32, i32) {
    %c0_i32 = arith.constant 0 : i32
    %c0_i32_0 = arith.constant 0 : i32
    return %arg0, %arg1, %c0_i32 : i32, i32, i32
  }
}

</mosaic_0001>

<bundles_post_ra>
// kernel: tpu_custom_call.1
= control target key start
LH: loop header
LB: loop body
LE: loop exit
PB: predicated region body
PF: predicated region fallthrough
CT: control target
= control target key end

     0   :  { %8 = vsyncpa [#allocation3], 0  ;;  %s692_s0 = inlined_call_operand.hbm [shape: f32[2,16,64], index: 0, kind: input, shape index: {}]   ;;  %s693_s1 = inlined_call_operand.vmem [shape: f32[16,16], index: 1, kind: input, shape index: {}]   ;;  %s694_s2 = inlined_call_operand.vmem [shape: f32[16,1], index: 2, kind: input, shape index: {}]   ;;  %s695_s3 = inlined_call_operand.vmem [shape: f32[2,64,12], index: 3, kind: output, shape index: {}]  }
   0x1   :  { %10 = vsyncpa [#allocation3 + $0x1], 0  ;;  %s584_s12 = smov 0   ;;  %s586_s13 = smov 0  }
   0x2   :  { %s588_s14 = smov 0   ;;  %s590_s15 = smov 0  }
   0x3   :  { %s592_s16 = smov 0   ;;  %s594_s17 = smov 0  }
   0x4 LB: > { %s400_s18 = sadd.s32 4294967295, %s559_s17   ;;  %s28_s19 = sadd.s32 1, %s555_s16  ;;  %s559_s17 = sphi %s594_s17, %s16_s17   ;;  %s555_s16 = sphi %s592_s16, %s702_s16   ;;  %s551_s15 = sphi %s590_s15, %s701_s15   ;;  %s547_s14 = sphi %s588_s14, %s700_s14   ;;  %s543_s13 = sphi %s586_s13, %s699_s13   ;;  %s539_s12 = sphi %s584_s12, %s698_s12  }
   0x5   : > { %p30_p0 = scmp.ge.s32.totalorder %s28_s19, 2  ;;  %s37_s20 = sadd.s32 1, %s547_s14 }
   0x6   : > { %p44_p1 = scmp.ne.s32.totalorder %s547_s14, %s543_s13  ;;  %p45_p2 = scmp.eq.s32.totalorder %s559_s17, 0 }
   0x7   : > { %s704_s19 = smov (%p30_p0, %s28_s19), 0  ;;  %p50_p4 = scmp.ne.s32.totalorder %s543_s13, %s539_s12 }
   0x8   : > { %p620_p3 = por %p45_p2, %p44_p1  ;;  %s32_s22 = ssub.s32 %s555_s16, %s704_s19 }
   0x9   : > { %p51_p5 = scmp.eq.s32.totalorder %s400_s18, 0  ;;  %p35_p6 = scmp.eq.s32.totalorder %s32_s22, 0 }
   0xa   : > { %p425_p8 = scmp.lt.s32.totalorder %s559_s17, 2  ;;  %s150_s25 = sand.u32 1, %s547_s14  }
   0xb   : > { %p627_p7 = por %p51_p5, %p50_p4  ;;  %s415_s26 = sshll.u32 %s555_s16, 4 }
   0xc   : > { %s633_s24 = scalar_select %p35_p6, %s547_s14, %s37_s20  }
   0xd   : > { %s404_s27 = sshll.u32 %s150_s25, 4  ;;  %s160_s30 = scalar_lea.hbm %s692_s0, %s415_s26 }
   0xe   : > { %s161_s4 = sshll.u32 %s160_s30, 4  ;;  %s154_s5 = scalar_lea.vmem [#allocation2], %s404_s27  ;;  %s162_s4 = int_to_ptr.hbm [resolvable:$true] %s161_s4 }
   0xf   : > { %s163_s6 = sshll.u32 %s154_s5, 4  ;;  %p422_p9 = pnand %p425_p8, %p620_p3  ;;  %s164_s6 = int_to_ptr.vmem [resolvable:$true] %s163_s6 }
  0x10   : > { %p407_p10 = scmp.ge.s32.totalorder %s559_s17, 1  ;;  %p171_p11 = scmp.lt.s32.totalorder %s559_s17, 3 }
  0x11   : > { %s151_s7 = scalar_lea.sflag [#allocation3], %s150_s25  ;;  %s561_s8 = smov 128  }
  0x12   : > { %s562_s9 = smov 8   ;;  %p172_p12 = pnand %p407_p10, %p171_p11 }
  0x13   : > { %424 = dma.hbm_to_vmem [thread:$0]  (!%p422_p9), %s162_s4, 256, %s164_s6, %s151_s7, %s561_s8, %s561_s8, %s562_s9  }
  0x14   : > { %175 = sbr.rel (%p172_p12) target bundleno = 380 (0x17c), region = 32  ;;  %s177_s10 = sand.u32 (!%p172_p12), 1, %s543_s13  }
  0x15   : > { %s408_s11 = sshll.u32 (!%p172_p12), %s177_s10, 4  ;;  %s178_s12 = scalar_lea.sflag (!%p172_p12), [#allocation3], %s177_s10 }
  0x16   : > { %s181_s18 = scalar_lea.vmem (!%p172_p12), [#allocation2], %s408_s11 }
  0x19   : > { %534 = dma.done.wait (%p627_p7), %s178_s12, 256  }
  0x1a   : > { %536 = vsyncadd (%p627_p7), %s178_s12, 4294967040  ;;  %v563_v0 = vmov 0   ;;  %v224_v1 = vld [vmem:[%s181_s18 + $0x8] sm:$0xff]  ;;  %v223_v2 = vld [vmem:[%s181_s18] sm:$0xff]  ;;  %vm235_vm0 = vcmask 130048   ;;  %p210_p13 = scmp.lt.s32.totalorder %s551_s15, 1 }
  0x1b   : > { %478 = vset.pattern.permute.xlu0 %v563_v0  ;;  %256 = vmatpush.msra.mxu0 %v224_v1  ;;  %v219_v3 = vld [vmem:[%s693_s1] sm:$0xff]  ;;  %v220_v4 = vld [vmem:[%s693_s1 + $0x8] sm:$0xff]  ;;  %vm297_vm1 = vcmask 97280  }
  0x1c   : > { %417 = vmatpush.msra.mxu1 %v224_v1  ;;  %v221_v5 = vld [vmem:[%s694_s2] sm:$0xff]  ;;  %v222_v6 = vld [vmem:[%s694_s2 + $0x8] sm:$0xff]  ;;  %s706_s15 = smov (!%p210_p13, %s551_s15), 1 }
  0x1d   : > { %227 = vperm.xlu0 %478, %v221_v5   ;;  %257 = vmatpush.msra.mxu0 %v223_v2  ;;  %s416_s29 = sshll.u32 %s706_s15, 6 }
  0x1e   : > { %418 = vmatpush.msra.mxu1 %v223_v2  ;;  %411 = vmatmul.msk.f32.vlgmr.msra.gmra.mxu0 %vm235_vm0, %v219_v3  ;;  %s217_s5 = scalar_lea.vmem %s695_s3, %s416_s29 }
  0x1f   : > { %412 = vmatmul.msk.f32.vlgmr.msra.gmra.mxu1 %vm235_vm0, %v220_v4 }
  0x25   : > { %232 = vperm.xlu0 %478, %v222_v6  }
  0x8f   : > { %v228_v7 = vpop.permute.xlu0 %227 }
  0x97   : > { %v233_v10 = vpop.permute.xlu0 %232 }
  0x9b   : > { %v259_v8 = vpop.f32.mrf.mxu0 }
  0x9c   : > { %v260_v9 = vadd.f32 %v259_v8, %v228_v7  ;;  %v262_v11 = vpop.f32.mrf.mxu1 }
  0x9d   : > { %v263_v12 = vadd.f32 %v262_v11, %v233_v10 }
  0x9e   : > { %265 = vxpose.xlu1.b32.start [1/2] (short) (narrow) %v260_v9, 64 }
  0xa6   : > { %266 = vxpose.xlu1.b32.end [2/2] (short) (narrow) %v263_v12, 64 }
 0x142   : > { %v281_v13 = vpop.trf.xlu1 }
 0x143   : > { %298 = vst.msk [vmem:[%s217_s5] sm:$0xff] %vm297_vm1, %v281_v13 }
 0x14a   : > { %v282_v14 = vpop.trf.xlu1 }
 0x14b   : > { %299 = vst.msk [vmem:[%s217_s5 + $0x8] sm:$0xff] %vm297_vm1, %v282_v14 }
 0x152   : > { %v283_v15 = vpop.trf.xlu1 }
 0x153   : > { %300 = vst.msk [vmem:[%s217_s5 + $0x10] sm:$0xff] %vm297_vm1, %v283_v15 }
 0x15a   : > { %v284_v16 = vpop.trf.xlu1 }
 0x15b   : > { %301 = vst.msk [vmem:[%s217_s5 + $0x18] sm:$0xff] %vm297_vm1, %v284_v16 }
 0x162   : > { %v285_v17 = vpop.trf.xlu1 }
 0x163   : > { %302 = vst.msk [vmem:[%s217_s5 + $0x20] sm:$0xff] %vm297_vm1, %v285_v17 }
 0x16a   : > { %v286_v18 = vpop.trf.xlu1 }
 0x16b   : > { %303 = vst.msk [vmem:[%s217_s5 + $0x28] sm:$0xff] %vm297_vm1, %v286_v18 }
 0x172   : > { %v287_v19 = vpop.trf.xlu1 }
 0x173   : > { %304 = vst.msk [vmem:[%s217_s5 + $0x30] sm:$0xff] %vm297_vm1, %v287_v19 }
 0x17a   : > { %v288_v20 = vpop.trf.xlu1 }
 0x17b   : > { %305 = vst.msk [vmem:[%s217_s5 + $0x38] sm:$0xff] %vm297_vm1, %v288_v20 }
 0x17c PF: > { %s16_s17 = sadd.s32 1, %s559_s17   ;;  %s698_s12 = smov %s543_s13 }
 0x17d   : > { %p13_p0 = scmp.ge.s32.totalorder %s16_s17, 4   ;;  %s699_s13 = smov %s547_s14 }
 0x17e   : > { %s700_s14 = smov %s633_s24  ;;  %s701_s15 = smov %s555_s16 }
 0x17f   : > { %s702_s16 = smov %s704_s19  ;;  %15 = sbr.rel (!%p13_p0) target bundleno = 4 (0x4), region = 72 }
 0x184   :  { %336 = vsyncpa [#allocation3], 1 }
 0x185   :  { %338 = vsyncpa [#allocation3 + $0x1], 1 }

</bundles_post_ra>
